<compile_context>
chip_gen: v7x
topology: tpu7x:2x2x1
jax: 0.10.0
libtpu: 0.0.40
codegen_flags: <defaults>
</compile_context>

<pallas_src>
import jax
import jax.numpy as jnp
from jax.experimental import pallas as pl
from jax.experimental.pallas import tpu as pltpu


def _round_up(x, m):
    return ((x + m - 1) // m) * m


def mlp_kernel(ctx_ref, act_ref, w1c_ref, w1a_ref, b1_ref, w2_ref, b2_ref,
               w3p_ref, b3_ref, o_ref):
    # fc1 on the split input (no concat needed anywhere).
    h1 = (jnp.dot(ctx_ref[...], w1c_ref[...], preferred_element_type=jnp.float32)
          + jnp.dot(act_ref[...], w1a_ref[...], preferred_element_type=jnp.float32)
          + b1_ref[...])
    h1 = jnp.maximum(h1, 0.0)                                   # relu, [TB, H]

    # fc2
    h2 = jnp.dot(h1, w2_ref[...], preferred_element_type=jnp.float32) + b2_ref[...]
    h2 = jnp.maximum(h2, 0.0)                                   # relu, [TB, 8]

    # fc3, computed transposed so the store is a lane-dense, unmasked slab:
    #   w3p: [8, 8]  (row 0 holds the real weight vector, rows 1..7 are zero)
    #   h2 : [TB, 8]
    #   z  : [8, TB] (row 0 is the real pre-activation)
    z = jax.lax.dot_general(w3p_ref[...], h2, (((1,), (1,)), ((), ())),
                            preferred_element_type=jnp.float32)
    z = z + b3_ref[0, 0]                                        # scalar bias from SMEM
    o_ref[...] = jax.nn.sigmoid(z)                              # [8, TB]


def neural_network2_forward(context, action, params, *, max_batch_tile=1024):
    """context: [B, context_dim], action: [B, num_arms*action_dim] -> [B]."""
    context = context.astype(jnp.float32)
    action = action.astype(jnp.float32)
    B, ctx_dim = context.shape
    act_dim = action.shape[1]
    H = params["w1"].shape[1]

    # Batch tile: multiple of 128 (lane-dense output / aligned sublanes), capped so
    # double-buffered activation tiles stay tiny relative to VMEM on all gens.
    TB = min(max_batch_tile, _round_up(B, 128))
    B_pad = _round_up(B, TB)
    if B_pad != B:
        context = jnp.pad(context, ((0, B_pad - B), (0, 0)))
        action = jnp.pad(action, ((0, B_pad - B), (0, 0)))

    # Pre-split / pre-pack the (already [in, out]-transposed) weights.
    w1c = params["w1"][:ctx_dim]                                # [ctx_dim, H]
    w1a = params["w1"][ctx_dim:]                                # [act_dim, H]
    b1 = params["b1"].reshape(1, H)
    w2 = params["w2"]                                           # [H, 8]
    b2 = params["b2"].reshape(1, 8)
    w3p = jnp.zeros((8, 8), jnp.float32).at[0, :].set(params["w3"].reshape(-1))
    b3 = params["b3"].reshape(1, 1)                             # SMEM scalar

    grid = (B_pad // TB,)
    flops = 2 * B_pad * (ctx_dim * H + act_dim * H + H * 8 + 8 * 8)
    bytes_accessed = (B_pad * (ctx_dim + act_dim) * 4            # streamed activations
                      + ((ctx_dim + act_dim) * H + H * 8 + 8 * 8 + H + 8 + 1) * 4
                      + B_pad * 8 * 4)                           # output slab

    out = pl.pallas_call(
        mlp_kernel,
        out_shape=jax.ShapeDtypeStruct((8, B_pad), jnp.float32),
        grid=grid,
        in_specs=[
            pl.BlockSpec((TB, ctx_dim), lambda i: (i, 0)),       # streamed
            pl.BlockSpec((TB, act_dim), lambda i: (i, 0)),       # streamed
            pl.BlockSpec((ctx_dim, H), lambda i: (0, 0)),        # resident weights
            pl.BlockSpec((act_dim, H), lambda i: (0, 0)),
            pl.BlockSpec((1, H), lambda i: (0, 0)),
            pl.BlockSpec((H, 8), lambda i: (0, 0)),
            pl.BlockSpec((1, 8), lambda i: (0, 0)),
            pl.BlockSpec((8, 8), lambda i: (0, 0)),
            pl.BlockSpec(memory_space=pltpu.MemorySpace.SMEM),   # b3 scalar
        ],
        out_specs=pl.BlockSpec((8, TB), lambda i: (0, i)),
        compiler_params=pltpu.CompilerParams(
            dimension_semantics=("parallel",)),
        cost_estimate=pl.CostEstimate(
            flops=flops, transcendentals=B_pad * 8,
            bytes_accessed=bytes_accessed),
    )(context, action, w1c, w1a, b1, w2, b2, w3p, b3)

    # Row 0 of the lane-dense slab holds the real result; drop batch padding.
    return out[0, :B]


def init_params(key, context_dim, num_arms, action_dim, hidden_size):
    """Deterministic init mimicking torch.nn.Linear (uniform +/- 1/sqrt(fan_in)).

    Weights are stored already transposed to [in, out] for the kernel.
    Biases are kept 2-D [1, out].
    """
    input_dim = context_dim + num_arms * action_dim
    dims = [(input_dim, hidden_size), (hidden_size, 8), (8, 1)]
    params = {}
    for idx, (fan_in, fan_out) in enumerate(dims, start=1):
        key, kw, kb = jax.random.split(key, 3)
        bound = 1.0 / jnp.sqrt(float(fan_in))
        params[f"w{idx}"] = jax.random.uniform(
            kw, (fan_in, fan_out), jnp.float32, -bound, bound)
        params[f"b{idx}"] = jax.random.uniform(
            kb, (1, fan_out), jnp.float32, -bound, bound)
    return params


def reference_forward(context, action, params):
    combined = jnp.concatenate([context, action], axis=1).astype(jnp.float32)
    h1 = jax.nn.relu(combined @ params["w1"] + params["b1"])
    h2 = jax.nn.relu(h1 @ params["w2"] + params["b2"])
    return jax.nn.sigmoid(h2 @ params["w3"] + params["b3"]).reshape(-1)


if __name__ == "__main__":
    # Small shapes consistent with the module's constructor.
    batch = 8
    context_dim = 16
    num_arms = 4
    action_dim = 4
    hidden_size = 32

    key = jax.random.PRNGKey(0)
    k_ctx, k_act, k_par = jax.random.split(key, 3)

    context = jax.random.normal(k_ctx, (batch, context_dim), jnp.float32)
    action = jax.random.normal(k_act, (batch, num_arms * action_dim), jnp.float32)
    params = init_params(k_par, context_dim, num_arms, action_dim, hidden_size)

    out = neural_network2_forward(context, action, params)
    out = jax.block_until_ready(out)

    ref = reference_forward(context, action, params)
    assert out.shape == (batch,)
    assert jnp.allclose(out, ref, atol=1e-5, rtol=1e-5)

    print("KERNEL_OK")
</pallas_src>

<mosaic_0001>
module attributes {stable_mosaic.version = 11 : i64} {
  func.func @mlp_kernel(%arg0: i32, %arg1: memref<128x16xf32, #tpu.memory_space<vmem>>, %arg2: memref<128x16xf32, #tpu.memory_space<vmem>>, %arg3: memref<16x32xf32, #tpu.memory_space<vmem>>, %arg4: memref<16x32xf32, #tpu.memory_space<vmem>>, %arg5: memref<1x32xf32, #tpu.memory_space<vmem>>, %arg6: memref<32x8xf32, #tpu.memory_space<vmem>>, %arg7: memref<1x8xf32, #tpu.memory_space<vmem>>, %arg8: memref<8x8xf32, #tpu.memory_space<vmem>>, %arg9: memref<1x1xf32, #tpu.memory_space<smem>>, %arg10: memref<8x128xf32, #tpu.memory_space<vmem>>) attributes {dimension_semantics = [#tpu.dimension_semantics<parallel>], iteration_bounds = array<i64: 1>, scalar_prefetch = 0 : i64, scratch_operands = 0 : i64, tpu.core_type = #tpu.core_type<tc>, window_params = [{transform_indices = @transform_0, window_bounds = array<i64: 128, 16>}, {transform_indices = @transform_1, window_bounds = array<i64: 128, 16>}, {pipeline_mode = #tpu.pipeline_mode<synchronous>, transform_indices = @transform_2, window_bounds = array<i64: 16, 32>}, {pipeline_mode = #tpu.pipeline_mode<synchronous>, transform_indices = @transform_3, window_bounds = array<i64: 16, 32>}, {pipeline_mode = #tpu.pipeline_mode<synchronous>, transform_indices = @transform_4, window_bounds = array<i64: 1, 32>}, {pipeline_mode = #tpu.pipeline_mode<synchronous>, transform_indices = @transform_5, window_bounds = array<i64: 32, 8>}, {pipeline_mode = #tpu.pipeline_mode<synchronous>, transform_indices = @transform_6, window_bounds = array<i64: 1, 8>}, {pipeline_mode = #tpu.pipeline_mode<synchronous>, transform_indices = @transform_7, window_bounds = array<i64: 8, 8>}, {transform_indices = @transform_8, window_bounds = array<i64: 1, 1>}, {transform_indices = @transform_9, window_bounds = array<i64: 8, 128>}]} {
    %c0 = arith.constant 0 : index
    %c0_0 = arith.constant 0 : index
    %0 = vector.load %arg1[%c0, %c0_0] : memref<128x16xf32, #tpu.memory_space<vmem>>, vector<128x16xf32>
    %c0_1 = arith.constant 0 : index
    %c0_2 = arith.constant 0 : index
    %1 = vector.load %arg3[%c0_1, %c0_2] : memref<16x32xf32, #tpu.memory_space<vmem>>, vector<16x32xf32>
    %cst = arith.constant dense<0.000000e+00> : vector<128x32xf32>
    %2 = tpu.matmul %0, %1, %cst {dimension_numbers = #tpu.dot_dimension_numbers<[1], [0], [0], [1], [0, 0, 1, 1], [], []>} : vector<128x16xf32>, vector<16x32xf32>, vector<128x32xf32> -> vector<128x32xf32>
    %c0_3 = arith.constant 0 : index
    %c0_4 = arith.constant 0 : index
    %3 = vector.load %arg2[%c0_3, %c0_4] : memref<128x16xf32, #tpu.memory_space<vmem>>, vector<128x16xf32>
    %c0_5 = arith.constant 0 : index
    %c0_6 = arith.constant 0 : index
    %4 = vector.load %arg4[%c0_5, %c0_6] : memref<16x32xf32, #tpu.memory_space<vmem>>, vector<16x32xf32>
    %cst_7 = arith.constant dense<0.000000e+00> : vector<128x32xf32>
    %5 = tpu.matmul %3, %4, %cst_7 {dimension_numbers = #tpu.dot_dimension_numbers<[1], [0], [0], [1], [0, 0, 1, 1], [], []>} : vector<128x16xf32>, vector<16x32xf32>, vector<128x32xf32> -> vector<128x32xf32>
    %6 = arith.addf %2, %5 : vector<128x32xf32>
    %c0_8 = arith.constant 0 : index
    %c0_9 = arith.constant 0 : index
    %7 = vector.load %arg5[%c0_8, %c0_9] : memref<1x32xf32, #tpu.memory_space<vmem>>, vector<1x32xf32>
    %8 = vector.broadcast %7 : vector<1x32xf32> to vector<128x32xf32>
    %9 = arith.addf %6, %8 : vector<128x32xf32>
    %cst_10 = arith.constant 0.000000e+00 : f32
    %10 = vector.broadcast %cst_10 : f32 to vector<128x32xf32>
    %11 = arith.maximumf %9, %10 : vector<128x32xf32>
    %c0_11 = arith.constant 0 : index
    %c0_12 = arith.constant 0 : index
    %12 = vector.load %arg6[%c0_11, %c0_12] : memref<32x8xf32, #tpu.memory_space<vmem>>, vector<32x8xf32>
    %cst_13 = arith.constant dense<0.000000e+00> : vector<128x8xf32>
    %13 = tpu.matmul %11, %12, %cst_13 {dimension_numbers = #tpu.dot_dimension_numbers<[1], [0], [0], [1], [0, 0, 1, 1], [], []>} : vector<128x32xf32>, vector<32x8xf32>, vector<128x8xf32> -> vector<128x8xf32>
    %c0_14 = arith.constant 0 : index
    %c0_15 = arith.constant 0 : index
    %14 = vector.load %arg7[%c0_14, %c0_15] : memref<1x8xf32, #tpu.memory_space<vmem>>, vector<1x8xf32>
    %15 = vector.broadcast %14 : vector<1x8xf32> to vector<128x8xf32>
    %16 = arith.addf %13, %15 : vector<128x8xf32>
    %cst_16 = arith.constant 0.000000e+00 : f32
    %17 = vector.broadcast %cst_16 : f32 to vector<128x8xf32>
    %18 = arith.maximumf %16, %17 : vector<128x8xf32>
    %c0_17 = arith.constant 0 : index
    %c0_18 = arith.constant 0 : index
    %19 = vector.load %arg8[%c0_17, %c0_18] : memref<8x8xf32, #tpu.memory_space<vmem>>, vector<8x8xf32>
    %cst_19 = arith.constant dense<0.000000e+00> : vector<8x128xf32>
    %20 = tpu.matmul %19, %18, %cst_19 {dimension_numbers = #tpu.dot_dimension_numbers<[1], [1], [0], [0], [0, 0, 1, 0], [], []>} : vector<8x8xf32>, vector<128x8xf32>, vector<8x128xf32> -> vector<8x128xf32>
    %c0_20 = arith.constant 0 : index
    %c0_21 = arith.constant 0 : index
    %21 = memref.load %arg9[%c0_20, %c0_21] : memref<1x1xf32, #tpu.memory_space<smem>>
    %22 = vector.broadcast %21 : f32 to vector<8x128xf32>
    %23 = arith.addf %20, %22 : vector<8x128xf32>
    %24 = arith.negf %23 : vector<8x128xf32>
    %25 = math.exp %24 : vector<8x128xf32>
    %cst_22 = arith.constant 1.000000e+00 : f32
    %26 = vector.broadcast %cst_22 : f32 to vector<8x128xf32>
    %27 = arith.addf %26, %25 : vector<8x128xf32>
    %28 = arith.divf %26, %27 : vector<8x128xf32>
    %c0_23 = arith.constant 0 : index
    %c0_24 = arith.constant 0 : index
    %29 = vector.load %arg10[%c0_23, %c0_24] : memref<8x128xf32, #tpu.memory_space<vmem>>, vector<8x128xf32>
    tpu.vector_store %arg10[%c0_23, %c0_24], %28 {strides = array<i32>} : memref<8x128xf32, #tpu.memory_space<vmem>>, vector<8x128xf32>,
    return
  }
  func.func @transform_0(%arg0: i32) -> (i32, i32) {
    %c0_i32 = arith.constant 0 : i32
    %c0_i32_0 = arith.constant 0 : i32
    return %arg0, %c0_i32 : i32, i32
  }
  func.func @transform_1(%arg0: i32) -> (i32, i32) {
    %c0_i32 = arith.constant 0 : i32
    %c0_i32_0 = arith.constant 0 : i32
    return %arg0, %c0_i32 : i32, i32
  }
  func.func @transform_2(%arg0: i32) -> (i32, i32) {
    %c0_i32 = arith.constant 0 : i32
    %c0_i32_0 = arith.constant 0 : i32
    %c0_i32_1 = arith.constant 0 : i32
    return %c0_i32, %c0_i32_0 : i32, i32
  }
  func.func @transform_3(%arg0: i32) -> (i32, i32) {
    %c0_i32 = arith.constant 0 : i32
    %c0_i32_0 = arith.constant 0 : i32
    %c0_i32_1 = arith.constant 0 : i32
    return %c0_i32, %c0_i32_0 : i32, i32
  }
  func.func @transform_4(%arg0: i32) -> (i32, i32) {
    %c0_i32 = arith.constant 0 : i32
    %c0_i32_0 = arith.constant 0 : i32
    %c0_i32_1 = arith.constant 0 : i32
    return %c0_i32, %c0_i32_0 : i32, i32
  }
  func.func @transform_5(%arg0: i32) -> (i32, i32) {
    %c0_i32 = arith.constant 0 : i32
    %c0_i32_0 = arith.constant 0 : i32
    %c0_i32_1 = arith.constant 0 : i32
    return %c0_i32, %c0_i32_0 : i32, i32
  }
  func.func @transform_6(%arg0: i32) -> (i32, i32) {
    %c0_i32 = arith.constant 0 : i32
    %c0_i32_0 = arith.constant 0 : i32
    %c0_i32_1 = arith.constant 0 : i32
    return %c0_i32, %c0_i32_0 : i32, i32
  }
  func.func @transform_7(%arg0: i32) -> (i32, i32) {
    %c0_i32 = arith.constant 0 : i32
    %c0_i32_0 = arith.constant 0 : i32
    %c0_i32_1 = arith.constant 0 : i32
    return %c0_i32, %c0_i32_0 : i32, i32
  }
  func.func @transform_8(%arg0: i32) -> (i32, i32) {
    %c0_i32 = arith.constant 0 : i32
    %c0_i32_0 = arith.constant 0 : i32
    %c0_i32_1 = arith.constant 0 : i32
    return %c0_i32, %c0_i32_0 : i32, i32
  }
  func.func @transform_9(%arg0: i32) -> (i32, i32) {
    %c0_i32 = arith.constant 0 : i32
    %c0_i32_0 = arith.constant 0 : i32
    return %c0_i32, %arg0 : i32, i32
  }
}

</mosaic_0001>

<bundles_post_ra>
// kernel: tpu_custom_call.1
= control target key start
LH: loop header
LB: loop body
LE: loop exit
PB: predicated region body
PF: predicated region fallthrough
CT: control target
= control target key end

     0   :  { %vm70_vm0 = vcmask 130048   ;;  %s1500_s0 = inlined_call_operand.vmem [shape: f32[128,16], index: 0, kind: input, shape index: {}]   ;;  %s1501_s1 = inlined_call_operand.vmem [shape: f32[128,16], index: 1, kind: input, shape index: {}]   ;;  %s1502_s2 = inlined_call_operand.vmem [shape: f32[16,32], index: 2, kind: input, shape index: {}]   ;;  %s1503_s3 = inlined_call_operand.vmem [shape: f32[16,32], index: 3, kind: input, shape index: {}]   ;;  %s1504_s4 = inlined_call_operand.vmem [shape: f32[1,32], index: 4, kind: input, shape index: {}]   ;;  %s1505_s5 = inlined_call_operand.vmem [shape: f32[32,8], index: 5, kind: input, shape index: {}]   ;;  %s1506_s6 = inlined_call_operand.vmem [shape: f32[1,8], index: 6, kind: input, shape index: {}]   ;;  %s1507_s7 = inlined_call_operand.vmem [shape: f32[8,8], index: 7, kind: input, shape index: {}]   ;;  %s1508_s8 = inlined_call_operand.<no memory space> [shape: f32[1,1], index: 8, kind: input, shape index: {}]   ;;  %s1509_s9 = inlined_call_operand.hbm [shape: f32[8,128], index: 9, kind: output, shape index: {}]  }
   0x1   :  { %v68_v0 = vld [vmem:[%s1503_s3] sm:$0xff]  ;;  %v69_v1 = vld [vmem:[%s1503_s3 + $0x8] sm:$0xff]  ;;  %v54_v8 = vld [vmem:[%s1501_s1 + $0x10] sm:$0xff] }
   0x2   :  { %v52_v2 = vld [vmem:[%s1501_s1] sm:$0xff]  ;;  %v1127_v3 = vpack.c.bf16 %v69_v1, %v68_v0  ;;  %v51_v5 = vld [vmem:[%s1502_s2 + $0x8] sm:$0xff]  ;;  %v55_v9 = vld [vmem:[%s1501_s1 + $0x18] sm:$0xff] }
   0x3   :  { %1008 = vmatprep.mubr.msk.f32.mxu0 %vm70_vm0, %v52_v2  ;;  %v50_v4 = vld [vmem:[%s1502_s2] sm:$0xff]  ;;  %v53_v7 = vld [vmem:[%s1501_s1 + $0x8] sm:$0xff] }
   0x4   :  { %v1131_v6 = vpack.c.bf16 %v51_v5, %v50_v4  ;;  %1128 = vmatprep.subr.bf16.mxu0 %v1127_v3  ;;  %v56_v10 = vld [vmem:[%s1501_s1 + $0x20] sm:$0xff]  ;;  %v57_v11 = vld [vmem:[%s1501_s1 + $0x28] sm:$0xff] }
   0x5   :  { %1130 = vmatpush3.bf16.msra.mxu0 %v1127_v3  ;;  %v496_v12 = vld [vmem:[%s1505_s5] sm:$0xff]  ;;  %v497_v13 = vld [vmem:[%s1505_s5 + $0x8] sm:$0xff] }
   0x6   :  { %1132 = vmatprep.subr.bf16.mxu0 %v1131_v6 }
   0x8   :  { %1009 = vmatmul.mubr.msk.f32.vlgmr.msra.gmra.mrb[0].mxu0 %vm70_vm0, %v53_v7 }
   0x9   :  { %1134 = vmatpush3.bf16.msra.mxu0 %v1131_v6  ;;  %1011 = vmatprep.mubr.msk.f32.mxu0 %vm70_vm0, %v54_v8 }
   0xc   :  { %1012 = vmatmul.mubr.msk.f32.gmra.mrb[2].mxu0 %vm70_vm0, %v55_v9 }
   0xd   :  { %1014 = vmatprep.mubr.msk.f32.mxu0 %vm70_vm0, %v56_v10 }
   0xe   :  { %15 = vsyncpa [#allocation4], 0  ;;  %v58_v14 = vld [vmem:[%s1501_s1 + $0x30] sm:$0xff]  ;;  %v1135_v15 = vpack.c.bf16 %v497_v13, %v496_v12  ;;  %v59_v16 = vld [vmem:[%s1501_s1 + $0x38] sm:$0xff]  ;;  %vm507_vm1 = vcmask 261120   ;;  %vm1224_vm2 = vmmov 0  }
   0xf   :  { %v60_v17 = vld [vmem:[%s1501_s1 + $0x40] sm:$0xff]  ;;  %v61_v18 = vld [vmem:[%s1501_s1 + $0x48] sm:$0xff]  ;;  %v62_v19 = vld [vmem:[%s1501_s1 + $0x50] sm:$0xff]  ;;  %vm720_vm3 = vcmask 64512   ;;  %s1226_s21 = smov [#allocation3]  }
  0x10   :  { %1015 = vmatmul.mubr.msk.f32.gmra.mrb[4].mxu0 %vm70_vm0, %v57_v11  ;;  %1136 = vmatprep.subr.bf16.mxu1 %v1135_v15  ;;  %v63_v20 = vld [vmem:[%s1501_s1 + $0x58] sm:$0xff]  ;;  %v64_v21 = vld [vmem:[%s1501_s1 + $0x60] sm:$0xff]  ;;  %v65_v22 = vld [vmem:[%s1501_s1 + $0x68] sm:$0xff]  ;;  %s855_s22 = sshll.u32 %s1226_s21, 4  ;;  %s856_s22 = int_to_ptr.vmem [resolvable:$true] %s855_s22 }
  0x11   :  { %1017 = vmatprep.mubr.msk.f32.mxu0 %vm70_vm0, %v58_v14  ;;  %1138 = vmatpush3.bf16.msra.mxu1 %v1135_v15  ;;  %v66_v23 = vld [vmem:[%s1501_s1 + $0x70] sm:$0xff]  ;;  %v67_v24 = vld [vmem:[%s1501_s1 + $0x78] sm:$0xff]  ;;  %v34_v25 = vld [vmem:[%s1500_s0] sm:$0xff]  ;;  %p1204_p1 = scmp.lt.s32.totalorder %s856_s22, %s856_s22 }
  0x12   :  { %v35_v26 = vld [vmem:[%s1500_s0 + $0x8] sm:$0xff]  ;;  %v36_v27 = vld [vmem:[%s1500_s0 + $0x10] sm:$0xff]  ;;  %v37_v28 = vld [vmem:[%s1500_s0 + $0x18] sm:$0xff] }
  0x13   :  { %v38_v29 = vld [vmem:[%s1500_s0 + $0x20] sm:$0xff]  ;;  %v39_v30 = vld [vmem:[%s1500_s0 + $0x28] sm:$0xff]  ;;  %v40_v31 = vld [vmem:[%s1500_s0 + $0x30] sm:$0xff] }
  0x14   :  { %1018 = vmatmul.mubr.msk.f32.gmra.mrb[6].mxu0 %vm70_vm0, %v59_v16  ;;  %v41_v32 = vld [vmem:[%s1500_s0 + $0x38] sm:$0xff]  ;;  %v42_v33 = vld [vmem:[%s1500_s0 + $0x40] sm:$0xff]  ;;  %v43_v34 = vld [vmem:[%s1500_s0 + $0x48] sm:$0xff] }
  0x15   :  { %1020 = vmatprep.mubr.msk.f32.mxu0 %vm70_vm0, %v60_v17  ;;  %v44_v35 = vld [vmem:[%s1500_s0 + $0x50] sm:$0xff]  ;;  %v45_v36 = vld [vmem:[%s1500_s0 + $0x58] sm:$0xff]  ;;  %v46_v37 = vld [vmem:[%s1500_s0 + $0x60] sm:$0xff] }
  0x16   :  { %v47_v38 = vld [vmem:[%s1500_s0 + $0x68] sm:$0xff]  ;;  %v48_v39 = vld [vmem:[%s1500_s0 + $0x70] sm:$0xff]  ;;  %v49_v40 = vld [vmem:[%s1500_s0 + $0x78] sm:$0xff] }
  0x17   :  { %v498_v41 = vld [vmem:[%s1505_s5 + $0x10] sm:$0xff]  ;;  %v499_v42 = vld [vmem:[%s1505_s5 + $0x18] sm:$0xff]  ;;  %v895_v44 = vld [vmem:[%s1504_s4] ss:$0 sm:$0xff] }
  0x18   :  { %1021 = vmatmul.mubr.msk.f32.gmra.mrb[8].mxu0 %vm70_vm0, %v61_v18  ;;  %v1139_v43 = vpack.c.bf16 %v499_v42, %v498_v41  ;;  %vm1454_vm4 = vmpackc.low %vm720_vm3, %vm720_vm3 }
  0x19   :  { %1023 = vmatprep.mubr.msk.f32.mxu0 %vm70_vm0, %v62_v19 }
  0x1a   :  { %1140 = vmatprep.subr.bf16.mxu1 %v1139_v43 }
  0x1b   :  { %1142 = vmatpush3.bf16.msra.mxu1 %v1139_v43 }
  0x1c   :  { %1024 = vmatmul.mubr.msk.f32.gmra.mrb[10].mxu0 %vm70_vm0, %v63_v20 }
  0x1d   :  { %1026 = vmatprep.mubr.msk.f32.mxu0 %vm70_vm0, %v64_v21 }
  0x20   :  { %1027 = vmatmul.mubr.msk.f32.gmra.mrb[12].mxu0 %vm70_vm0, %v65_v22 }
  0x21   :  { %1029 = vmatprep.mubr.msk.f32.mxu0 %vm70_vm0, %v66_v23 }
  0x24   :  { %1030 = vmatmul.mubr.msk.f32.gmra.mrb[14].mxu0 %vm70_vm0, %v67_v24 }
  0x25   :  { %1036 = vmatprep.mubr.msk.f32.mxu0 %vm70_vm0, %v34_v25 }
  0x28   :  { %1037 = vmatmul.mubr.msk.f32.vlgmr.msra.gmra.mrb[0].mxu0 %vm70_vm0, %v35_v26 }
  0x29   :  { %1039 = vmatprep.mubr.msk.f32.mxu0 %vm70_vm0, %v36_v27 }
  0x2c   :  { %1040 = vmatmul.mubr.msk.f32.gmra.mrb[2].mxu0 %vm70_vm0, %v37_v28 }
  0x2d   :  { %1042 = vmatprep.mubr.msk.f32.mxu0 %vm70_vm0, %v38_v29  ;;  %v1223_v29 = vmov 0.0|0.0  }
  0x2e   :  { %1143 = vmatprep.subr.bf16.mxu1 %v1223_v29 }
  0x30   :  { %1043 = vmatmul.mubr.msk.f32.gmra.mrb[4].mxu0 %vm70_vm0, %v39_v30  ;;  %v1225_v30 = vmov 0.0  }
  0x31   :  { %1045 = vmatprep.mubr.msk.f32.mxu0 %vm70_vm0, %v40_v31  ;;  %v896_v31 = vld [vmem:[%s1506_s6] ss:$0 sm:$0xff] }
  0x34   :  { %1046 = vmatmul.mubr.msk.f32.gmra.mrb[6].mxu0 %vm70_vm0, %v41_v32 }
  0x35   :  { %1048 = vmatprep.mubr.msk.f32.mxu0 %vm70_vm0, %v42_v33 }
  0x38   :  { %1049 = vmatmul.mubr.msk.f32.gmra.mrb[8].mxu0 %vm70_vm0, %v43_v34 }
  0x39   :  { %1051 = vmatprep.mubr.msk.f32.mxu0 %vm70_vm0, %v44_v35 }
  0x3c   :  { %1052 = vmatmul.mubr.msk.f32.gmra.mrb[10].mxu0 %vm70_vm0, %v45_v36 }
  0x3d   :  { %1054 = vmatprep.mubr.msk.f32.mxu0 %vm70_vm0, %v46_v37 }
  0x40   :  { %1055 = vmatmul.mubr.msk.f32.gmra.mrb[12].mxu0 %vm70_vm0, %v47_v38 }
  0x41   :  { %1057 = vmatprep.mubr.msk.f32.mxu0 %vm70_vm0, %v48_v39 }
  0x44   :  { %1058 = vmatmul.mubr.msk.f32.gmra.mrb[14].mxu0 %vm70_vm0, %v49_v40 }
  0xfb   :  { %v1038_v45 = vpop.f32.mrb[0].mxu0 }
  0xfc   :  { %v465_v46 = vadd.f32 %v1038_v45, %v895_v44  ;;  %v378_v47 = vpop.f32.mrb[1].mxu0 }
  0xfd   :  { %v464_v48 = vadd.f32 %v895_v44, %v378_v47 }
  0xfe   :  { %v481_v51 = vmax.f32 %v465_v46, 0.0 }
  0xff   :  { %v480_v49 = vmax.f32 %v464_v48, 0.0  ;;  %v1041_v50 = vpop.f32.mrb[2].mxu0 }
 0x100   :  { %v467_v52 = vadd.f32 %v1041_v50, %v895_v44  ;;  %v388_v53 = vpop.f32.mrb[3].mxu0 }
 0x101   :  { %v466_v54 = vadd.f32 %v895_v44, %v388_v53  ;;  %1068 = vmatprep.mubr.msk.f32.mxu1 %vm507_vm1, %v480_v49 }
 0x102   :  { %1069 = vmatmul.mubr.msk.f32.vlgmr.msra.gmra.mrb[0].mxu1 %vm507_vm1, %v481_v51  ;;  %v483_v57 = vmax.f32 %v467_v52, 0.0 }
 0x103   :  { %v482_v55 = vmax.f32 %v466_v54, 0.0  ;;  %v1044_v56 = vpop.f32.mrb[4].mxu0 }
 0x104   :  { %v469_v58 = vadd.f32 %v1044_v56, %v895_v44  ;;  %v398_v59 = vpop.f32.mrb[5].mxu0 }
 0x105   :  { %v468_v60 = vadd.f32 %v895_v44, %v398_v59  ;;  %1071 = vmatprep.mubr.msk.f32.mxu1 %vm507_vm1, %v482_v55 }
 0x106   :  { %1072 = vmatmul.mubr.msk.f32.gmra.mrb[2].mxu1 %vm507_vm1, %v483_v57  ;;  %v485_v63 = vmax.f32 %v469_v58, 0.0 }
 0x107   :  { %v484_v61 = vmax.f32 %v468_v60, 0.0  ;;  %v1047_v62 = vpop.f32.mrb[6].mxu0 }
 0x108   :  { %v471_v0 = vadd.f32 %v1047_v62, %v895_v44  ;;  %v408_v1 = vpop.f32.mrb[7].mxu0 }
 0x109   :  { %v470_v2 = vadd.f32 %v895_v44, %v408_v1  ;;  %1074 = vmatprep.mubr.msk.f32.mxu1 %vm507_vm1, %v484_v61 }
 0x10a   :  { %1075 = vmatmul.mubr.msk.f32.gmra.mrb[4].mxu1 %vm507_vm1, %v485_v63  ;;  %v487_v5 = vmax.f32 %v471_v0, 0.0 }
 0x10b   :  { %v486_v3 = vmax.f32 %v470_v2, 0.0  ;;  %v1050_v4 = vpop.f32.mrb[8].mxu0 }
 0x10c   :  { %v473_v6 = vadd.f32 %v1050_v4, %v895_v44  ;;  %v418_v7 = vpop.f32.mrb[9].mxu0 }
 0x10d   :  { %v472_v8 = vadd.f32 %v895_v44, %v418_v7  ;;  %1077 = vmatprep.mubr.msk.f32.mxu1 %vm507_vm1, %v486_v3 }
 0x10e   :  { %1078 = vmatmul.mubr.msk.f32.gmra.mrb[6].mxu1 %vm507_vm1, %v487_v5  ;;  %v489_v11 = vmax.f32 %v473_v6, 0.0 }
 0x10f   :  { %v488_v9 = vmax.f32 %v472_v8, 0.0  ;;  %v1053_v10 = vpop.f32.mrb[10].mxu0 }
 0x110   :  { %v475_v12 = vadd.f32 %v1053_v10, %v895_v44  ;;  %v428_v13 = vpop.f32.mrb[11].mxu0 }
 0x111   :  { %v474_v14 = vadd.f32 %v895_v44, %v428_v13  ;;  %1080 = vmatprep.mubr.msk.f32.mxu1 %vm507_vm1, %v488_v9 }
 0x112   :  { %1081 = vmatmul.mubr.msk.f32.gmra.mrb[8].mxu1 %vm507_vm1, %v489_v11  ;;  %v491_v17 = vmax.f32 %v475_v12, 0.0 }
 0x113   :  { %v490_v15 = vmax.f32 %v474_v14, 0.0  ;;  %v1056_v16 = vpop.f32.mrb[12].mxu0 }
 0x114   :  { %v477_v18 = vadd.f32 %v1056_v16, %v895_v44  ;;  %v438_v19 = vpop.f32.mrb[13].mxu0 }
 0x115   :  { %v476_v20 = vadd.f32 %v895_v44, %v438_v19  ;;  %1083 = vmatprep.mubr.msk.f32.mxu1 %vm507_vm1, %v490_v15 }
 0x116   :  { %1084 = vmatmul.mubr.msk.f32.gmra.mrb[10].mxu1 %vm507_vm1, %v491_v17  ;;  %v493_v23 = vmax.f32 %v477_v18, 0.0 }
 0x117   :  { %v492_v21 = vmax.f32 %v476_v20, 0.0  ;;  %v1059_v22 = vpop.f32.mrb[14].mxu0 }
 0x118   :  { %v479_v24 = vadd.f32 %v1059_v22, %v895_v44  ;;  %v448_v25 = vpop.f32.mrb[15].mxu0 }
 0x119   :  { %v478_v26 = vadd.f32 %v895_v44, %v448_v25  ;;  %1086 = vmatprep.mubr.msk.f32.mxu1 %vm507_vm1, %v492_v21  ;;  %v717_v25 = vld [vmem:[%s1507_s7] sm:$0xff]  ;;  %s1199_s7 = scalar_lea.vmem %s856_s22, 128 }
 0x11a   :  { %1087 = vmatmul.mubr.msk.f32.gmra.mrb[12].mxu1 %vm507_vm1, %v493_v23  ;;  %v495_v28 = vmax.f32 %v479_v24, 0.0  ;;  %p1200_p0 = scmp.ne.s32.totalorder %s856_s22, %s1199_s7  ;;  %p1205_p2 = scmp.lt.s32.totalorder %s1199_s7, %s1199_s7 }
 0x11b   :  { %v494_v27 = vmax.f32 %v478_v26, 0.0  ;;  %v719_v26 = vstv %s1508_s8 }
 0x11c   :  { %p1206_p3 = por %p1205_p2, %p1204_p1 }
 0x11d   :  { %1089 = vmatprep.mubr.msk.f32.mxu1 %vm507_vm1, %v494_v27 }
 0x11e   :  { %1090 = vmatmul.mubr.msk.f32.gmra.mrb[14].mxu1 %vm507_vm1, %v495_v28  ;;  %p1207_p4 = pnand %p1206_p3, %p1200_p0 }
 0x11f   :  { %1124 = vmatprep.mubr.msk.f32.mxu1 %vm1224_vm2, %v1225_v30 }
 0x1d5   :  { %v1070_v32 = vpop.f32.mrb[0].mxu1 }
 0x1d6   :  { %v628_v33 = vadd.f32 %v1070_v32, %v896_v31  ;;  %v622_v34 = vpop.f32.mrb[1].mxu1 }
 0x1d7   :  { %v623_v35 = vadd.f32 %v896_v31, %v622_v34 }
 0x1d8   :  { %v702_v36 = vmax.f32 %v628_v33, 0.0 }
 0x1d9   :  { %v701_v37 = vmax.f32 %v623_v35, 0.0  ;;  %v1073_v38 = vpop.f32.mrb[2].mxu1 }
 0x1da   :  { %v638_v39 = vadd.f32 %v1073_v38, %v896_v31  ;;  %v632_v40 = vpop.f32.mrb[3].mxu1 }
 0x1db   :  { %v1144_v42 = vpack.c.bf16 %v702_v36, %v701_v37  ;;  %v633_v43 = vadd.f32 %v896_v31, %v632_v40 }
 0x1dc   :  { %v704_v44 = vmax.f32 %v638_v39, 0.0 }
 0x1dd   :  { %v703_v45 = vmax.f32 %v633_v43, 0.0  ;;  %v1076_v46 = vpop.f32.mrb[4].mxu1  ;;  %1146 = vmatpush3.bf16.xpose.msk.msra.mxu1 %vm1454_vm4, %v1144_v42 }
 0x1de   :  { %v648_v47 = vadd.f32 %v1076_v46, %v896_v31  ;;  %v642_v48 = vpop.f32.mrb[5].mxu1  ;;  %1147 = vmatprep.subr.bf16.mxu1 %v1223_v29 }
 0x1df   :  { %v1148_v49 = vpack.c.bf16 %v704_v44, %v703_v45  ;;  %v643_v50 = vadd.f32 %v896_v31, %v642_v48 }
 0x1e0   :  { %v706_v51 = vmax.f32 %v648_v47, 0.0 }
 0x1e1   :  { %v705_v52 = vmax.f32 %v643_v50, 0.0  ;;  %v1079_v53 = vpop.f32.mrb[6].mxu1 }
 0x1e2   :  { %v658_v54 = vadd.f32 %v1079_v53, %v896_v31  ;;  %v652_v55 = vpop.f32.mrb[7].mxu1 }
 0x1e3   :  { %v1152_v56 = vpack.c.bf16 %v706_v51, %v705_v52  ;;  %v653_v57 = vadd.f32 %v896_v31, %v652_v55 }
 0x1e4   :  { %v708_v58 = vmax.f32 %v658_v54, 0.0 }
 0x1e5   :  { %v707_v59 = vmax.f32 %v653_v57, 0.0  ;;  %v1082_v60 = vpop.f32.mrb[8].mxu1  ;;  %1150 = vmatpush3.bf16.xpose.msk.msra.mxu1 %vm1454_vm4, %v1148_v49 }
 0x1e6   :  { %v668_v61 = vadd.f32 %v1082_v60, %v896_v31  ;;  %v662_v62 = vpop.f32.mrb[9].mxu1  ;;  %1151 = vmatprep.subr.bf16.mxu1 %v1223_v29 }
 0x1e7   :  { %v1156_v63 = vpack.c.bf16 %v708_v58, %v707_v59  ;;  %v663_v0 = vadd.f32 %v896_v31, %v662_v62 }
 0x1e8   :  { %v710_v1 = vmax.f32 %v668_v61, 0.0 }
 0x1e9   :  { %v709_v2 = vmax.f32 %v663_v0, 0.0  ;;  %v1085_v3 = vpop.f32.mrb[10].mxu1 }
 0x1ea   :  { %v678_v4 = vadd.f32 %v1085_v3, %v896_v31  ;;  %v672_v5 = vpop.f32.mrb[11].mxu1 }
 0x1eb   :  { %v1160_v6 = vpack.c.bf16 %v710_v1, %v709_v2  ;;  %v673_v7 = vadd.f32 %v896_v31, %v672_v5 }
 0x1ec   :  { %v712_v8 = vmax.f32 %v678_v4, 0.0 }
 0x1ed   :  { %v711_v9 = vmax.f32 %v673_v7, 0.0  ;;  %v1088_v10 = vpop.f32.mrb[12].mxu1  ;;  %1154 = vmatpush3.bf16.xpose.msk.msra.mxu1 %vm1454_vm4, %v1152_v56 }
 0x1ee   :  { %v688_v11 = vadd.f32 %v1088_v10, %v896_v31  ;;  %v682_v12 = vpop.f32.mrb[13].mxu1  ;;  %1155 = vmatprep.subr.bf16.mxu1 %v1223_v29 }
 0x1ef   :  { %v1164_v13 = vpack.c.bf16 %v712_v8, %v711_v9  ;;  %v683_v14 = vadd.f32 %v896_v31, %v682_v12 }
 0x1f0   :  { %v714_v15 = vmax.f32 %v688_v11, 0.0 }
 0x1f1   :  { %v713_v16 = vmax.f32 %v683_v14, 0.0  ;;  %v1091_v17 = vpop.f32.mrb[14].mxu1 }
 0x1f2   :  { %v698_v18 = vadd.f32 %v1091_v17, %v896_v31  ;;  %v692_v19 = vpop.f32.mrb[15].mxu1 }
 0x1f3   :  { %v1168_v20 = vpack.c.bf16 %v714_v15, %v713_v16  ;;  %v693_v21 = vadd.f32 %v896_v31, %v692_v19 }
 0x1f4   :  { %v716_v22 = vmax.f32 %v698_v18, 0.0 }
 0x1f5   :  { %v715_v23 = vmax.f32 %v693_v21, 0.0  ;;  %1158 = vmatpush3.bf16.xpose.msk.msra.mxu1 %vm1454_vm4, %v1156_v63 }
 0x1f6   :  { %1159 = vmatprep.subr.bf16.mxu1 %v1223_v29 }
 0x1f7   :  { %v1172_v24 = vpack.c.bf16 %v716_v22, %v715_v23 }
 0x1fd   :  { %1162 = vmatpush3.bf16.xpose.msk.msra.mxu1 %vm1454_vm4, %v1160_v6 }
 0x1fe   :  { %1163 = vmatprep.subr.bf16.mxu1 %v1223_v29 }
 0x205   :  { %1166 = vmatpush3.bf16.xpose.msk.msra.mxu1 %vm1454_vm4, %v1164_v13 }
 0x206   :  { %1167 = vmatprep.subr.bf16.mxu1 %v1223_v29 }
 0x20d   :  { %1170 = vmatpush3.bf16.xpose.msk.msra.mxu1 %vm1454_vm4, %v1168_v20 }
 0x20e   :  { %1171 = vmatprep.subr.bf16.mxu1 %v1223_v29 }
 0x215   :  { %1174 = vmatpush3.bf16.xpose.msk.msra.mxu1 %vm1454_vm4, %v1172_v24 }
 0x21c   :  { %1125 = vmatmul.mubr.msk.f32.vlgmr.msra.gmra.mrb[16].mxu1 %vm720_vm3, %v717_v25 }
 0x2ef   :  { %v838_v27 = vpop.f32.mrb[16].mxu1 }
 0x2f0   :  { %v839_v28 = vadd.f32 %v838_v27, %v719_v26  ;;  %v1126_v30 = vpop.f32.mrb[17].mxu1 }
 0x2f2   :  { %v930_v31 = vmul.f32 -1.442695, %v839_v28 }
 0x2f4   :  { %1195 = vpow2.f32 %v930_v31 }
 0x2fe   :  { %v1196_v32 = vpop.eup %1195 }
 0x2ff   :  { %v845_v29 = vadd.f32 1.0, %v1196_v32 }
 0x301   :  { %1197 = vrcp.f32 %v845_v29 }
 0x30b   :  { %v1198_v33 = vpop.eup %1197 }
 0x30c   :  { %848 = vst [vmem:[#allocation3] sm:$0xff] %v1198_v33 }
 0x30d   :  { %1210 = shalt.err (!%p1207_p4)
}
 0x30e   :  { %s1211_s2 = scalar_lea.hbm %s1509_s9, 128 }
 0x30f   :  { %p1212_p5 = scmp.ne.s32.totalorder %s1509_s9, %s1211_s2  ;;  %p1215_p6 = scmp.lt.u32.totalorder %s1211_s2, %s1509_s9 }
 0x311   :  { %p1217_p7 = pnand %p1215_p6, %p1212_p5 }
 0x313   :  { %1220 = shalt.err (!%p1217_p7)
}
 0x314   :  { %858 = dma.vmem_to_hbm [thread:$0]  %s856_s22, 128, %s1509_s9, [#allocation4]  }
 0x315   :  { %1221 = dma.done.wait [#allocation4], 128  }
 0x316   :  { %1222 = vsyncadd [#allocation4], 4294967168 }
 0x317   :  { %862 = vsyncpa [#allocation4], 1 }

</bundles_post_ra>
